<compile_context>
chip_gen: v6e
topology: v6e:2x2x1
jax: 0.10.0
libtpu: 0.0.40
codegen_flags: <defaults>
</compile_context>

<pallas_src>
import math

import jax
import jax.numpy as jnp
from jax.experimental import pallas as pl
from jax.experimental.pallas import tpu as pltpu


def _round_up(v, m):
    return ((v + m - 1) // m) * m


def gat_attn_kernel(s_src_ref, s_dst_ref, h_ref, out_ref, m_sc, l_sc, acc_sc):
    ki = pl.program_id(1)

    @pl.when(ki == 0)
    def _():
        m_sc[...] = jnp.full_like(m_sc, -jnp.inf)
        l_sc[...] = jnp.zeros_like(l_sc)
        acc_sc[...] = jnp.zeros_like(acc_sc)

    # e[q, k] = leaky_relu(s_src[q] + s_dst[k]), negative_slope = 0.01
    e = s_src_ref[...] + s_dst_ref[...]              # [TQ, 1] + [1, TK] -> [TQ, TK]
    e = jnp.where(e > 0, e, 0.01 * e)

    # Online softmax over the key (neighbor) axis.
    m_prev = m_sc[...]
    m_new = jnp.maximum(m_prev, jnp.max(e, axis=1, keepdims=True))
    alpha = jnp.exp(m_prev - m_new)
    p = jnp.exp(e - m_new)
    l_sc[...] = alpha * l_sc[...] + jnp.sum(p, axis=1, keepdims=True)
    acc_sc[...] = alpha * acc_sc[...] + jnp.dot(
        p, h_ref[...], preferred_element_type=jnp.float32)
    m_sc[...] = m_new
    # TODO(synk): F.dropout(p=0.6) on the attention probs is stochastic; implemented
    # as eval-mode identity.

    @pl.when(ki == pl.num_programs(1) - 1)
    def _():
        inv_l = pl.reciprocal(l_sc[...], approx=True)      # EUP slot, ~free
        h_prime = acc_sc[...] * inv_l
        # concat=True -> ELU(alpha=1.0). exp(x)-1 kept (instead of expm1) for
        # guaranteed Mosaic lowering; abs error is negligible for x < 0.
        out_ref[...] = jnp.where(
            h_prime > 0, h_prime, jnp.exp(h_prime) - 1.0).astype(out_ref.dtype)


def gat_conv_forward(x, adj, weight, attention):
    """GATConv forward (num_heads=1, concat=True).

    adj is accepted for signature parity, but the reference forward never reads it.
    The bias parameter exists in __init__ but is never applied in forward.
    """
    del adj
    n, _ = x.shape
    fout = weight.shape[1]                           # out_features * num_heads (heads=1)

    # ---- projection + scoring folded into ONE lane-dense XLA matmul ----
    f_pad = _round_up(max(fout, 128), 128)
    a_src = attention[:fout, :]                      # [fout, 1]
    a_dst = attention[fout:, :]                      # [fout, 1]
    w_aug = jnp.concatenate(
        [jnp.pad(weight, ((0, 0), (0, f_pad - fout))),
         weight @ a_src, weight @ a_dst], axis=1)    # [fin, f_pad + 2]
    h_aug = jnp.dot(x, w_aug, preferred_element_type=jnp.float32)   # [n, f_pad + 2]

    # ---- tile / pad the node axis ----
    if n <= 256:
        tile_q = tile_k = _round_up(n, 8)
    else:
        tile_q, tile_k = 128, 256
    n_pad = _round_up(n, max(tile_q, tile_k))

    h = jnp.pad(h_aug[:, :f_pad], ((0, n_pad - n), (0, 0)))             # [n_pad, f_pad]
    s_src = jnp.pad(h_aug[:, f_pad:f_pad + 1], ((0, n_pad - n), (0, 0)))  # [n_pad, 1]
    # padded keys get a very negative score -> zero softmax weight
    s_dst = jnp.pad(h_aug[:, f_pad + 1:f_pad + 2].T,
                    ((0, 0), (0, n_pad - n)), constant_values=-1e30)     # [1, n_pad]

    out = pl.pallas_call(
        gat_attn_kernel,
        out_shape=jax.ShapeDtypeStruct((n_pad, f_pad), jnp.float32),
        grid_spec=pltpu.PrefetchScalarGridSpec(
            num_scalar_prefetch=0,
            grid=(n_pad // tile_q, n_pad // tile_k),
            in_specs=[
                pl.BlockSpec((tile_q, 1), lambda qi, ki: (qi, 0)),        # s_src
                pl.BlockSpec((1, tile_k), lambda qi, ki: (0, ki)),        # s_dst
                pl.BlockSpec((tile_k, f_pad), lambda qi, ki: (ki, 0)),    # h (keys)
            ],
            out_specs=pl.BlockSpec((tile_q, f_pad), lambda qi, ki: (qi, 0)),
            scratch_shapes=[
                pltpu.VMEM((tile_q, 1), jnp.float32),      # running max m
                pltpu.VMEM((tile_q, 1), jnp.float32),      # running denom l
                pltpu.VMEM((tile_q, f_pad), jnp.float32),  # running numerator acc
            ],
        ),
        compiler_params=pltpu.CompilerParams(
            dimension_semantics=("parallel", "arbitrary"),
            vmem_limit_bytes=32 * 1024 * 1024,
        ),
    )(s_src, s_dst, h)
    return out[:n, :fout]


def gat_conv_reference(x, adj, weight, attention):
    """Pure-JAX transcription of the PyTorch forward (num_heads=1, concat=True)."""
    del adj
    fout = weight.shape[1]
    h = x @ weight
    n = h.shape[0]
    a_input = jnp.concatenate(
        [jnp.tile(h, (1, n)).reshape(n * n, -1), jnp.tile(h, (n, 1))], axis=1
    ).reshape(n, -1, 2 * fout)
    e = jnp.matmul(a_input, attention)[:, :, 0]
    e = jnp.where(e > 0, e, 0.01 * e)                 # leaky_relu
    attn = jax.nn.softmax(e, axis=1)
    h_prime = attn @ h
    return jnp.where(h_prime > 0, h_prime, jnp.exp(h_prime) - 1.0)  # elu


if __name__ == "__main__":
    N, IN_F, OUT_F, HEADS = 64, 32, 32, 1
    key = jax.random.PRNGKey(0)
    kx, kadj, kw, ka = jax.random.split(key, 4)

    x = jax.random.normal(kx, (N, IN_F), dtype=jnp.float32)
    # adj is part of the module signature but unused by forward.
    adj = (jax.random.uniform(kadj, (N, N)) > 0.5).astype(jnp.float32)

    # Deterministic param init mirroring reset_parameters (uniform +/- 1/sqrt(fan)).
    stdv = 1.0 / math.sqrt(OUT_F * HEADS)
    weight = jax.random.uniform(kw, (IN_F, OUT_F * HEADS), jnp.float32, -stdv, stdv)
    attention = jax.random.uniform(ka, (2 * OUT_F, HEADS), jnp.float32, -stdv, stdv)
    # bias parameter exists in __init__ but is never used in forward -> omitted.

    out = gat_conv_forward(x, adj, weight, attention)
    out = jax.block_until_ready(out)

    ref = gat_conv_reference(x, adj, weight, attention)
    assert out.shape == (N, OUT_F)
    err = float(jnp.max(jnp.abs(out - ref)))
    # Tolerance covers the approximate EUP reciprocal used for softmax normalization.
    assert jnp.allclose(out, ref, atol=2e-3, rtol=2e-3), err
    print("KERNEL_OK")
</pallas_src>

<mosaic_0001>
module attributes {stable_mosaic.version = 11 : i64} {
  func.func @gat_attn_kernel(%arg0: i32, %arg1: i32, %arg2: memref<64x1xf32, #tpu.memory_space<vmem>>, %arg3: memref<1x64xf32, #tpu.memory_space<vmem>>, %arg4: memref<64x128xf32, #tpu.memory_space<vmem>>, %arg5: memref<64x128xf32, #tpu.memory_space<vmem>>, %arg6: memref<64x1xf32, #tpu.memory_space<vmem>>, %arg7: memref<64x1xf32, #tpu.memory_space<vmem>>, %arg8: memref<64x128xf32, #tpu.memory_space<vmem>>) attributes {dimension_semantics = [#tpu.dimension_semantics<parallel>, #tpu.dimension_semantics<arbitrary>], iteration_bounds = array<i64: 1, 1>, scalar_prefetch = 0 : i64, scratch_operands = 3 : i64, tpu.core_type = #tpu.core_type<tc>, window_params = [{transform_indices = @transform_0, window_bounds = array<i64: 64, 1>}, {transform_indices = @transform_1, window_bounds = array<i64: 1, 64>}, {transform_indices = @transform_2, window_bounds = array<i64: 64, 128>}, {transform_indices = @transform_3, window_bounds = array<i64: 64, 128>}]} {
    %c0_i32 = arith.constant 0 : i32
    %0 = arith.cmpi eq, %arg1, %c0_i32 : i32
    %1 = arith.extui %0 : i1 to i32
    %c0_i32_0 = arith.constant 0 : i32
    %2 = arith.cmpi ne, %1, %c0_i32_0 : i32
    scf.if %2 {
      %cst_24 = arith.constant 0xFF800000 : f32
      %39 = vector.broadcast %cst_24 : f32 to vector<64x1xf32>
      %c0_25 = arith.constant 0 : index
      %c0_26 = arith.constant 0 : index
      %40 = vector.load %arg6[%c0_25, %c0_26] : memref<64x1xf32, #tpu.memory_space<vmem>>, vector<64x1xf32>
      tpu.vector_store %arg6[%c0_25, %c0_26], %39 {strides = array<i32>} : memref<64x1xf32, #tpu.memory_space<vmem>>, vector<64x1xf32>,
      %cst_27 = arith.constant 0.000000e+00 : f32
      %41 = vector.broadcast %cst_27 : f32 to vector<64x1xf32>
      %c0_28 = arith.constant 0 : index
      %c0_29 = arith.constant 0 : index
      %42 = vector.load %arg7[%c0_28, %c0_29] : memref<64x1xf32, #tpu.memory_space<vmem>>, vector<64x1xf32>
      tpu.vector_store %arg7[%c0_28, %c0_29], %41 {strides = array<i32>} : memref<64x1xf32, #tpu.memory_space<vmem>>, vector<64x1xf32>,
      %cst_30 = arith.constant 0.000000e+00 : f32
      %43 = vector.broadcast %cst_30 : f32 to vector<64x128xf32>
      %c0_31 = arith.constant 0 : index
      %c0_32 = arith.constant 0 : index
      %44 = vector.load %arg8[%c0_31, %c0_32] : memref<64x128xf32, #tpu.memory_space<vmem>>, vector<64x128xf32>
      tpu.vector_store %arg8[%c0_31, %c0_32], %43 {strides = array<i32>} : memref<64x128xf32, #tpu.memory_space<vmem>>, vector<64x128xf32>,
    } else {
    }
    %c0 = arith.constant 0 : index
    %c0_1 = arith.constant 0 : index
    %3 = vector.load %arg2[%c0, %c0_1] : memref<64x1xf32, #tpu.memory_space<vmem>>, vector<64x1xf32>
    %c0_2 = arith.constant 0 : index
    %c0_3 = arith.constant 0 : index
    %4 = vector.load %arg3[%c0_2, %c0_3] : memref<1x64xf32, #tpu.memory_space<vmem>>, vector<1x64xf32>
    %5 = vector.broadcast %3 : vector<64x1xf32> to vector<64x64xf32>
    %6 = vector.broadcast %4 : vector<1x64xf32> to vector<64x64xf32>
    %7 = arith.addf %5, %6 : vector<64x64xf32>
    %cst = arith.constant 0.000000e+00 : f32
    %8 = vector.broadcast %cst : f32 to vector<64x64xf32>
    %9 = arith.cmpf ogt, %7, %8 : vector<64x64xf32>
    %cst_4 = arith.constant 0.00999999977 : f32
    %10 = vector.broadcast %cst_4 : f32 to vector<64x64xf32>
    %11 = arith.mulf %10, %7 : vector<64x64xf32>
    %12 = arith.select %9, %7, %11 : vector<64x64xi1>, vector<64x64xf32>
    %c0_5 = arith.constant 0 : index
    %c0_6 = arith.constant 0 : index
    %13 = vector.load %arg6[%c0_5, %c0_6] : memref<64x1xf32, #tpu.memory_space<vmem>>, vector<64x1xf32>
    %cst_7 = arith.constant dense<0xFF800000> : vector<64xf32>
    %14 = vector.multi_reduction <maximumf>, %12, %cst_7 [1] : vector<64x64xf32> to vector<64xf32>
    %15 = vector.shape_cast %14 : vector<64xf32> to vector<64x1xf32>
    %16 = arith.maximumf %13, %15 : vector<64x1xf32>
    %17 = arith.subf %13, %16 : vector<64x1xf32>
    %18 = math.exp %17 : vector<64x1xf32>
    %19 = vector.broadcast %16 : vector<64x1xf32> to vector<64x64xf32>
    %20 = arith.subf %12, %19 : vector<64x64xf32>
    %21 = math.exp %20 : vector<64x64xf32>
    %c0_8 = arith.constant 0 : index
    %c0_9 = arith.constant 0 : index
    %22 = vector.load %arg7[%c0_8, %c0_9] : memref<64x1xf32, #tpu.memory_space<vmem>>, vector<64x1xf32>
    %23 = arith.mulf %18, %22 : vector<64x1xf32>
    %cst_10 = arith.constant dense<0.000000e+00> : vector<64xf32>
    %24 = vector.multi_reduction <add>, %21, %cst_10 [1] : vector<64x64xf32> to vector<64xf32>
    %25 = vector.shape_cast %24 : vector<64xf32> to vector<64x1xf32>
    %26 = arith.addf %23, %25 : vector<64x1xf32>
    %c0_11 = arith.constant 0 : index
    %c0_12 = arith.constant 0 : index
    %27 = vector.load %arg7[%c0_11, %c0_12] : memref<64x1xf32, #tpu.memory_space<vmem>>, vector<64x1xf32>
    tpu.vector_store %arg7[%c0_11, %c0_12], %26 {strides = array<i32>} : memref<64x1xf32, #tpu.memory_space<vmem>>, vector<64x1xf32>,
    %c0_13 = arith.constant 0 : index
    %c0_14 = arith.constant 0 : index
    %28 = vector.load %arg8[%c0_13, %c0_14] : memref<64x128xf32, #tpu.memory_space<vmem>>, vector<64x128xf32>
    %29 = vector.broadcast %18 : vector<64x1xf32> to vector<64x128xf32>
    %30 = arith.mulf %29, %28 : vector<64x128xf32>
    %c0_15 = arith.constant 0 : index
    %c0_16 = arith.constant 0 : index
    %31 = vector.load %arg4[%c0_15, %c0_16] : memref<64x128xf32, #tpu.memory_space<vmem>>, vector<64x128xf32>
    %cst_17 = arith.constant dense<0.000000e+00> : vector<64x128xf32>
    %32 = tpu.matmul %21, %31, %cst_17 {dimension_numbers = #tpu.dot_dimension_numbers<[1], [0], [0], [1], [0, 0, 1, 1], [], []>} : vector<64x64xf32>, vector<64x128xf32>, vector<64x128xf32> -> vector<64x128xf32>
    %33 = arith.addf %30, %32 : vector<64x128xf32>
    %c0_18 = arith.constant 0 : index
    %c0_19 = arith.constant 0 : index
    %34 = vector.load %arg8[%c0_18, %c0_19] : memref<64x128xf32, #tpu.memory_space<vmem>>, vector<64x128xf32>
    tpu.vector_store %arg8[%c0_18, %c0_19], %33 {strides = array<i32>} : memref<64x128xf32, #tpu.memory_space<vmem>>, vector<64x128xf32>,
    %c0_20 = arith.constant 0 : index
    %c0_21 = arith.constant 0 : index
    %35 = vector.load %arg6[%c0_20, %c0_21] : memref<64x1xf32, #tpu.memory_space<vmem>>, vector<64x1xf32>
    tpu.vector_store %arg6[%c0_20, %c0_21], %16 {strides = array<i32>} : memref<64x1xf32, #tpu.memory_space<vmem>>, vector<64x1xf32>,
    %c0_i32_22 = arith.constant 0 : i32
    %36 = arith.cmpi eq, %arg1, %c0_i32_22 : i32
    %37 = arith.extui %36 : i1 to i32
    %c0_i32_23 = arith.constant 0 : i32
    %38 = arith.cmpi ne, %37, %c0_i32_23 : i32
    scf.if %38 {
      %c0_24 = arith.constant 0 : index
      %c0_25 = arith.constant 0 : index
      %39 = vector.load %arg7[%c0_24, %c0_25] : memref<64x1xf32, #tpu.memory_space<vmem>>, vector<64x1xf32>
      %40 = tpu.reciprocal %39 {approx = true} : vector<64x1xf32> -> vector<64x1xf32>
      %c0_26 = arith.constant 0 : index
      %c0_27 = arith.constant 0 : index
      %41 = vector.load %arg8[%c0_26, %c0_27] : memref<64x128xf32, #tpu.memory_space<vmem>>, vector<64x128xf32>
      %42 = vector.broadcast %40 : vector<64x1xf32> to vector<64x128xf32>
      %43 = arith.mulf %41, %42 : vector<64x128xf32>
      %cst_28 = arith.constant 0.000000e+00 : f32
      %44 = vector.broadcast %cst_28 : f32 to vector<64x128xf32>
      %45 = arith.cmpf ogt, %43, %44 : vector<64x128xf32>
      %46 = math.exp %43 : vector<64x128xf32>
      %cst_29 = arith.constant 1.000000e+00 : f32
      %47 = vector.broadcast %cst_29 : f32 to vector<64x128xf32>
      %48 = arith.subf %46, %47 : vector<64x128xf32>
      %49 = arith.select %45, %43, %48 : vector<64x128xi1>, vector<64x128xf32>
      %c0_30 = arith.constant 0 : index
      %c0_31 = arith.constant 0 : index
      %50 = vector.load %arg5[%c0_30, %c0_31] : memref<64x128xf32, #tpu.memory_space<vmem>>, vector<64x128xf32>
      tpu.vector_store %arg5[%c0_30, %c0_31], %49 {strides = array<i32>} : memref<64x128xf32, #tpu.memory_space<vmem>>, vector<64x128xf32>,
    } else {
    }
    return
  }
  func.func @transform_0(%arg0: i32, %arg1: i32) -> (i32, i32) {
    %c0_i32 = arith.constant 0 : i32
    %c0_i32_0 = arith.constant 0 : i32
    return %arg0, %c0_i32 : i32, i32
  }
  func.func @transform_1(%arg0: i32, %arg1: i32) -> (i32, i32) {
    %c0_i32 = arith.constant 0 : i32
    %c0_i32_0 = arith.constant 0 : i32
    return %c0_i32, %arg1 : i32, i32
  }
  func.func @transform_2(%arg0: i32, %arg1: i32) -> (i32, i32) {
    %c0_i32 = arith.constant 0 : i32
    %c0_i32_0 = arith.constant 0 : i32
    return %arg1, %c0_i32 : i32, i32
  }
  func.func @transform_3(%arg0: i32, %arg1: i32) -> (i32, i32) {
    %c0_i32 = arith.constant 0 : i32
    %c0_i32_0 = arith.constant 0 : i32
    return %arg0, %c0_i32 : i32, i32
  }
}

</mosaic_0001>

<bundles_post_ra>
// kernel: tpu_custom_call.1
= control target key start
LH: loop header
LB: loop body
LE: loop exit
PB: predicated region body
PF: predicated region fallthrough
CT: control target
= control target key end

     0   :  { %v844_v2 = vmov 0   ;;  %s1109_s0 = inlined_call_operand.vmem [shape: f32[64,1], index: 0, kind: input, shape index: {}]   ;;  %s1110_s1 = inlined_call_operand.vmem [shape: f32[1,64], index: 1, kind: input, shape index: {}]   ;;  %s1111_s2 = inlined_call_operand.vmem [shape: f32[64,128], index: 2, kind: input, shape index: {}]   ;;  %s1112_s3 = inlined_call_operand.hbm [shape: f32[64,128], index: 3, kind: output, shape index: {}]  }
   0x1   :  { %v45_v0 = vld [vmem:[%s1109_s0 + $0x8] sm:$0xff]  ;;  %v44_v1 = vld [vmem:[%s1109_s0] sm:$0xff]  ;;  %757 = vset.pattern.permute.xlu1 %v844_v2  ;;  %756 = vset.pattern.permute.xlu0 %v844_v2 }
   0x2   :  { %60 = vperm.xlu1 %757, %v45_v0   ;;  %55 = vperm.xlu0 %756, %v44_v1   ;;  %v49_v3 = vld [vmem:[%s1109_s0 + $0x28] sm:$0xff]  ;;  %v48_v4 = vld [vmem:[%s1109_s0 + $0x20] sm:$0xff] }
   0x3   :  { %8 = vsyncpa [#allocation6], 0  ;;  %v50_v5 = vld [vmem:[%s1109_s0 + $0x30] sm:$0xff]  ;;  %v51_v7 = vld [vmem:[%s1109_s0 + $0x38] sm:$0xff]  ;;  %vm139_vm0 = vcmask 523264   ;;  %vm19_vm5 = vcmask 7168  }
   0x4   :  { %v46_v6 = vld [vmem:[%s1109_s0 + $0x10] sm:$0xff]  ;;  %v47_v8 = vld [vmem:[%s1109_s0 + $0x18] sm:$0xff]  ;;  %v673_v9 = vld [vmem:[%s1110_s1] ss:$0 sm:$0xff]  ;;  %v845_v31 = vmov -inf   ;;  %v846_v51 = vmov 0.0  }
   0x5   :  { %20 = vst.msk [vmem:[#allocation2] sm:$0xff] %vm19_vm5, %v845_v31  ;;  %21 = vst.msk [vmem:[#allocation2 + $0x8] sm:$0xff] %vm19_vm5, %v845_v31  ;;  %v380_v62 = vld [vmem:[%s1111_s2 + $0x38] sm:$0xff] }
   0x6   :  { %80 = vperm.xlu1 %757, %v49_v3   ;;  %75 = vperm.xlu0 %756, %v48_v4   ;;  %22 = vst.msk [vmem:[#allocation2 + $0x10] sm:$0xff] %vm19_vm5, %v845_v31  ;;  %23 = vst.msk [vmem:[#allocation2 + $0x18] sm:$0xff] %vm19_vm5, %v845_v31  ;;  %v379_v3 = vld [vmem:[%s1111_s2 + $0x30] sm:$0xff] }
   0x7   :  { %24 = vst.msk [vmem:[#allocation2 + $0x20] sm:$0xff] %vm19_vm5, %v845_v31  ;;  %25 = vst.msk [vmem:[#allocation2 + $0x28] sm:$0xff] %vm19_vm5, %v845_v31  ;;  %706 = vmatprep.subr.mxu0 %v380_v62  ;;  %734 = vmatprep.subr.mxu1 %v380_v62 }
   0x8   :  { %26 = vst.msk [vmem:[#allocation2 + $0x30] sm:$0xff] %vm19_vm5, %v845_v31  ;;  %27 = vst.msk [vmem:[#allocation2 + $0x38] sm:$0xff] %vm19_vm5, %v845_v31  ;;  %707 = vmatpush3.msra.mxu0 %v380_v62  ;;  %742 = vmatpush3.msra.mxu1 %v380_v62 }
   0x9   :  { %28 = vst.msk [vmem:[#allocation3] sm:$0xff] %vm19_vm5, %v846_v51  ;;  %29 = vst.msk [vmem:[#allocation3 + $0x8] sm:$0xff] %vm19_vm5, %v846_v51  ;;  %708 = vmatprep.subr.mxu0 %v379_v3  ;;  %735 = vmatprep.subr.mxu1 %v379_v3 }
   0xa   :  { %85 = vperm.xlu1 %757, %v50_v5   ;;  %65 = vperm.xlu0 %756, %v46_v6   ;;  %30 = vst.msk [vmem:[#allocation3 + $0x10] sm:$0xff] %vm19_vm5, %v846_v51  ;;  %31 = vst.msk [vmem:[#allocation3 + $0x18] sm:$0xff] %vm19_vm5, %v846_v51 }
   0xb   :  { %32 = vst.msk [vmem:[#allocation3 + $0x20] sm:$0xff] %vm19_vm5, %v846_v51  ;;  %33 = vst.msk [vmem:[#allocation3 + $0x28] sm:$0xff] %vm19_vm5, %v846_v51  ;;  %709 = vmatpush3.msra.mxu0 %v379_v3  ;;  %743 = vmatpush3.msra.mxu1 %v379_v3 }
   0xc   :  { %34 = vst.msk [vmem:[#allocation3 + $0x30] sm:$0xff] %vm19_vm5, %v846_v51  ;;  %35 = vst.msk [vmem:[#allocation3 + $0x38] sm:$0xff] %vm19_vm5, %v846_v51  ;;  %v946_v52 = vld [vmem:[#allocation2] sm:$0xff]  ;;  %v953_v56 = vld [vmem:[#allocation2 + $0x8] sm:$0xff] }
   0xd   :  { %v969_v63 = vld [vmem:[#allocation2 + $0x10] sm:$0xff] }
   0xe   :  { %90 = vperm.xlu1 %757, %v51_v7   ;;  %70 = vperm.xlu0 %756, %v47_v8   ;;  %v951_v55 = vld [vmem:[#allocation2 + $0x20] sm:$0xff]  ;;  %v971_v0 = vld [vmem:[#allocation2 + $0x28] sm:$0xff] }
   0xf   :  { %v378_v8 = vld [vmem:[%s1111_s2 + $0x28] sm:$0xff] }
  0x10   :  { %710 = vmatprep.subr.mxu0 %v378_v8  ;;  %736 = vmatprep.subr.mxu1 %v378_v8 }
  0x11   :  { %711 = vmatpush3.msra.mxu0 %v378_v8  ;;  %744 = vmatpush3.msra.mxu1 %v378_v8 }
  0x7d   :  { %v61_v10 = vpop.permute.xlu1 %60  ;;  %v56_v11 = vpop.permute.xlu0 %55 }
  0x7e   :  { %v100_v12 = vadd.f32 %v673_v9, %v61_v10  ;;  %v99_v13 = vadd.f32 %v673_v9, %v56_v11  ;;  %v997_v10 = vld [vmem:[#allocation2 + $0x30] sm:$0xff] }
  0x80   :  { %v116_v14 = vmul.f32 0.01, %v100_v12  ;;  %v115_v15 = vmul.f32 0.01, %v99_v13  ;;  %vm107_vm1 = vcmp.gt.f32.partialorder %v99_v13, 0.0  ;;  %vm108_vm2 = vcmp.gt.f32.partialorder %v100_v12, 0.0 }
  0x81   :  { %v81_v16 = vpop.permute.xlu1 %80  ;;  %v76_v17 = vpop.permute.xlu0 %75 }
  0x82   :  { %v104_v18 = vadd.f32 %v673_v9, %v81_v16  ;;  %v103_v19 = vadd.f32 %v673_v9, %v76_v17  ;;  %v897_v20 = vsel %vm107_vm1, %v99_v13, %v115_v15  ;;  %v899_v21 = vsel %vm108_vm2, %v100_v12, %v116_v14  ;;  %v377_v13 = vld [vmem:[%s1111_s2 + $0x20] sm:$0xff] }
  0x83   :  { %v140_v22 = vsel %vm139_vm0, %v897_v20, -inf  ;;  %v143_v27 = vsel %vm139_vm0, %v899_v21, -inf  ;;  %712 = vmatprep.subr.mxu0 %v377_v13  ;;  %737 = vmatprep.subr.mxu1 %v377_v13 }
  0x84   :  { %v120_v23 = vmul.f32 0.01, %v104_v18  ;;  %v119_v24 = vmul.f32 0.01, %v103_v19  ;;  %141 = vmax.xlane.f32.xlu0 %v140_v22  ;;  %vm111_vm3 = vcmp.gt.f32.partialorder %v103_v19, 0.0  ;;  %vm112_vm4 = vcmp.gt.f32.partialorder %v104_v18, 0.0  ;;  %713 = vmatpush3.msra.mxu0 %v377_v13 }
  0x85   :  { %v86_v25 = vpop.permute.xlu1 %85  ;;  %v66_v26 = vpop.permute.xlu0 %65  ;;  %745 = vmatpush3.msra.mxu1 %v377_v13 }
  0x86   :  { %v105_v28 = vadd.f32 %v673_v9, %v86_v25  ;;  %v101_v29 = vadd.f32 %v673_v9, %v66_v26  ;;  %v905_v30 = vsel %vm111_vm3, %v103_v19, %v119_v24  ;;  %v918_v35 = vsel %vm112_vm4, %v104_v18, %v120_v23  ;;  %v1018_v18 = vld [vmem:[#allocation2 + $0x38] sm:$0xff]  ;;  %v375_v25 = vld [vmem:[%s1111_s2 + $0x10] sm:$0xff] }
  0x87   :  { %v152_v32 = vsel %vm139_vm0, %v905_v30, -inf  ;;  %v155_v41 = vsel %vm139_vm0, %v918_v35, -inf  ;;  %v376_v19 = vld [vmem:[%s1111_s2 + $0x18] sm:$0xff] }
  0x88   :  { %v121_v33 = vmul.f32 0.01, %v105_v28  ;;  %v117_v34 = vmul.f32 0.01, %v101_v29  ;;  %144 = vmax.xlane.f32.xlu0 %v143_v27  ;;  %153 = vmax.xlane.f32.xlu1 %v152_v32  ;;  %vm109_vm6 = vcmp.gt.f32.partialorder %v101_v29, 0.0  ;;  %vm113_vm7 = vcmp.gt.f32.partialorder %v105_v28, 0.0 }
  0x89   :  { %v91_v36 = vpop.permute.xlu1 %90  ;;  %v71_v37 = vpop.permute.xlu0 %70  ;;  %714 = vmatprep.subr.mxu0 %v376_v19  ;;  %738 = vmatprep.subr.mxu1 %v376_v19  ;;  %v374_v27 = vld [vmem:[%s1111_s2 + $0x8] sm:$0xff] }
  0x8a   :  { %v106_v38 = vadd.f32 %v673_v9, %v91_v36  ;;  %v102_v39 = vadd.f32 %v673_v9, %v71_v37  ;;  %v920_v40 = vsel %vm109_vm6, %v101_v29, %v117_v34  ;;  %v926_v45 = vsel %vm113_vm7, %v105_v28, %v121_v33  ;;  %v995_v9 = vld [vmem:[#allocation2 + $0x18] sm:$0xff]  ;;  %715 = vmatpush3.msra.mxu0 %v376_v19  ;;  %v373_v29 = vld [vmem:[%s1111_s2] sm:$0xff]  ;;  %s847_s2 = smov [#allocation5]  }
  0x8b   :  { %v146_v42 = vsel %vm139_vm0, %v920_v40, -inf  ;;  %v158_v47 = vsel %vm139_vm0, %v926_v45, -inf  ;;  %746 = vmatpush3.msra.mxu1 %v376_v19  ;;  %716 = vmatprep.subr.mxu0 %v375_v25  ;;  %s662_s17 = sshll.u32 %s847_s2, 4  ;;  %s663_s17 = int_to_ptr.vmem [resolvable:$true] %s662_s17 }
  0x8c   :  { %v122_v43 = vmul.f32 0.01, %v106_v38  ;;  %v118_v44 = vmul.f32 0.01, %v102_v39  ;;  %156 = vmax.xlane.f32.xlu0 %v155_v41  ;;  %147 = vmax.xlane.f32.xlu1 %v146_v42  ;;  %vm110_vm8 = vcmp.gt.f32.partialorder %v102_v39, 0.0  ;;  %vm114_vm9 = vcmp.gt.f32.partialorder %v106_v38, 0.0  ;;  %p827_p1 = scmp.lt.s32.totalorder %s663_s17, %s663_s17 }
  0x8d   :  { %717 = vmatpush3.msra.mxu0 %v375_v25  ;;  %739 = vmatprep.subr.mxu1 %v375_v25  ;;  %s822_s18 = scalar_lea.vmem %s663_s17, 1024 }
  0x8e   :  { %v928_v46 = vsel %vm110_vm8, %v102_v39, %v118_v44  ;;  %v934_v49 = vsel %vm114_vm9, %v106_v38, %v122_v43  ;;  %718 = vmatprep.subr.mxu0 %v374_v27  ;;  %747 = vmatpush3.msra.mxu1 %v375_v25  ;;  %p823_p0 = scmp.ne.s32.totalorder %s663_s17, %s822_s18  ;;  %p828_p2 = scmp.lt.s32.totalorder %s822_s18, %s822_s18 }
  0x8f   :  { %v149_v48 = vsel %vm139_vm0, %v928_v46, -inf  ;;  %v161_v50 = vsel %vm139_vm0, %v934_v49, -inf  ;;  %719 = vmatpush3.msra.mxu0 %v374_v27  ;;  %740 = vmatprep.subr.mxu1 %v374_v27 }
  0x90   :  { %159 = vmax.xlane.f32.xlu0 %v158_v47  ;;  %150 = vmax.xlane.f32.xlu1 %v149_v48  ;;  %p829_p3 = por %p828_p2, %p827_p1 }
  0x91   :  { %720 = vmatprep.subr.mxu0 %v373_v29  ;;  %748 = vmatpush3.msra.mxu1 %v374_v27 }
  0x92   :  { %721 = vmatpush3.msra.mxu0 %v373_v29  ;;  %741 = vmatprep.subr.mxu1 %v373_v29  ;;  %p830_p4 = pnand %p829_p3, %p823_p0 }
  0x93   :  { %749 = vmatpush3.msra.mxu1 %v373_v29 }
  0x94   :  { %162 = vmax.xlane.f32.xlu0 %v161_v50 }
 0x10d   :  { %v142_v53 = vpop.xlane.xlu0 %141 }
 0x10e   :  { %v949_v54 = vmax.f32 %v946_v52, %v142_v53 }
 0x110   :  { %v172_v57 = vsub.f32 %v946_v52, %v949_v54  ;;  %526 = vst.msk [vmem:[#allocation2] sm:$0xff] %vm19_vm5, %v949_v54  ;;  %198 = vperm.xlu1 %757, %v949_v54  }
 0x111   :  { %v154_v58 = vpop.xlane.xlu1 %153  ;;  %v145_v59 = vpop.xlane.xlu0 %144 }
 0x112   :  { %v961_v60 = vmax.f32 %v951_v55, %v154_v58  ;;  %v964_v61 = vmax.f32 %v953_v56, %v145_v59 }
 0x114   :  { %v176_v1 = vsub.f32 %v951_v55, %v961_v60  ;;  %530 = vst.msk [vmem:[#allocation2 + $0x20] sm:$0xff] %vm19_vm5, %v961_v60  ;;  %v173_v2 = vsub.f32 %v953_v56, %v964_v61  ;;  %527 = vst.msk [vmem:[#allocation2 + $0x8] sm:$0xff] %vm19_vm5, %v964_v61  ;;  %218 = vperm.xlu0 %756, %v961_v60   ;;  %203 = vperm.xlu1 %757, %v964_v61  }
 0x115   :  { %v148_v4 = vpop.xlane.xlu1 %147  ;;  %v157_v5 = vpop.xlane.xlu0 %156 }
 0x116   :  { %v987_v6 = vmax.f32 %v969_v63, %v148_v4  ;;  %v990_v7 = vmax.f32 %v971_v0, %v157_v5 }
 0x118   :  { %v174_v11 = vsub.f32 %v969_v63, %v987_v6  ;;  %528 = vst.msk [vmem:[#allocation2 + $0x10] sm:$0xff] %vm19_vm5, %v987_v6  ;;  %v177_v12 = vsub.f32 %v971_v0, %v990_v7  ;;  %531 = vst.msk [vmem:[#allocation2 + $0x28] sm:$0xff] %vm19_vm5, %v990_v7  ;;  %208 = vperm.xlu0 %756, %v987_v6   ;;  %223 = vperm.xlu1 %757, %v990_v7   ;;  %v188_v63 = vmul.f32 1.442695, %v176_v1 }
 0x119   :  { %v151_v14 = vpop.xlane.xlu1 %150  ;;  %v160_v15 = vpop.xlane.xlu0 %159 }
 0x11a   :  { %v1013_v16 = vmax.f32 %v995_v9, %v151_v14  ;;  %v1016_v17 = vmax.f32 %v997_v10, %v160_v15 }
 0x11c   :  { %v175_v22 = vsub.f32 %v995_v9, %v1013_v16  ;;  %529 = vst.msk [vmem:[#allocation2 + $0x18] sm:$0xff] %vm19_vm5, %v1013_v16  ;;  %v178_v23 = vsub.f32 %v997_v10, %v1016_v17  ;;  %532 = vst.msk [vmem:[#allocation2 + $0x30] sm:$0xff] %vm19_vm5, %v1016_v17  ;;  %213 = vperm.xlu0 %756, %v1013_v16   ;;  %228 = vperm.xlu1 %757, %v1016_v17   ;;  %v261_v17 = vld [vmem:[#allocation3 + $0x8] sm:$0xff] }
 0x11d   :  { %v163_v24 = vpop.xlane.xlu0 %162 }
 0x11e   :  { %v1037_v26 = vmax.f32 %v1018_v18, %v163_v24  ;;  %v180_v24 = vmul.f32 1.442695, %v172_v57  ;;  %v186_v54 = vmul.f32 1.442695, %v175_v22  ;;  %v182_v57 = vmul.f32 1.442695, %v173_v2 }
 0x11f   :  { %v192_v56 = vmul.f32 1.442695, %v178_v23  ;;  %v262_v22 = vld [vmem:[#allocation3 + $0x10] sm:$0xff] }
 0x120   :  { %v179_v28 = vsub.f32 %v1018_v18, %v1037_v26  ;;  %533 = vst.msk [vmem:[#allocation2 + $0x38] sm:$0xff] %vm19_vm5, %v1037_v26  ;;  %233 = vperm.xlu1 %757, %v1037_v26   ;;  %v264_v26 = vld [vmem:[#allocation3 + $0x20] sm:$0xff] }
 0x122   :  { %v194_v6 = vmul.f32 1.442695, %v179_v28 }
 0x18b   :  { %v199_v31 = vpop.permute.xlu1 %198 }
 0x18c   :  { %v236_v32 = vsub.f32 %v897_v20, %v199_v31  ;;  %v184_v31 = vmul.f32 1.442695, %v174_v11  ;;  %v260_v11 = vld [vmem:[#allocation3] sm:$0xff] }
 0x18e   :  { %v244_v33 = vmul.f32 1.442695, %v236_v32  ;;  %v190_v32 = vmul.f32 1.442695, %v177_v12 }
 0x18f   :  { %v219_v34 = vpop.permute.xlu0 %218  ;;  %v204_v36 = vpop.permute.xlu1 %203 }
 0x190   :  { %758 = vpow2.f32 %v244_v33  ;;  %v240_v37 = vsub.f32 %v905_v30, %v219_v34  ;;  %v237_v38 = vsub.f32 %v899_v21, %v204_v36 }
 0x192   :  { %v252_v39 = vmul.f32 1.442695, %v240_v37  ;;  %v246_v41 = vmul.f32 1.442695, %v237_v38  ;;  %v263_v37 = vld [vmem:[#allocation3 + $0x18] sm:$0xff] }
 0x193   :  { %v209_v42 = vpop.permute.xlu0 %208  ;;  %v224_v43 = vpop.permute.xlu1 %223 }
 0x194   :  { %760 = vpow2.f32 %v252_v39  ;;  %v238_v44 = vsub.f32 %v920_v40, %v209_v42  ;;  %v241_v47 = vsub.f32 %v918_v35, %v224_v43 }
 0x195   :  { %762 = vpow2.f32 %v246_v41  ;;  %v266_v41 = vld [vmem:[#allocation3 + $0x30] sm:$0xff] }
 0x196   :  { %v248_v48 = vmul.f32 1.442695, %v238_v44  ;;  %v254_v20 = vmul.f32 1.442695, %v241_v47 }
 0x197   :  { %v214_v50 = vpop.permute.xlu0 %213  ;;  %v229_v51 = vpop.permute.xlu1 %228 }
 0x198   :  { %764 = vpow2.f32 %v248_v48  ;;  %v239_v53 = vsub.f32 %v928_v46, %v214_v50  ;;  %v242_v30 = vsub.f32 %v926_v45, %v229_v51 }
 0x199   :  { %766 = vpow2.f32 %v254_v20  ;;  %v265_v20 = vld [vmem:[#allocation3 + $0x28] sm:$0xff] }
 0x19a   :  { %v250_v21 = vmul.f32 1.442695, %v239_v53  ;;  %v256_v58 = vmul.f32 1.442695, %v242_v30 }
 0x19b   :  { %v234_v59 = vpop.permute.xlu1 %233 }
 0x19c   :  { %768 = vpow2.f32 %v250_v21  ;;  %v243_v62 = vsub.f32 %v934_v49, %v234_v59  ;;  %v267_v59 = vld [vmem:[#allocation3 + $0x38] sm:$0xff] }
 0x19d   :  { %v759_v40 = vpop.eup %758  ;;  %770 = vpow2.f32 %v256_v58 }
 0x19e   :  { %v258_v35 = vmul.f32 1.442695, %v243_v62  ;;  %722 = vmatprep.mubr.msk.f32.mxu0 %vm139_vm0, %v759_v40  ;;  %v276_v3 = vsel %vm139_vm0, %v759_v40, 0.0 }
 0x19f   :  { %277 = vadd.xlane.f32.xlu0 %v276_v3 }
 0x1a0   :  { %772 = vpow2.f32 %v258_v35 }
 0x1a1   :  { %v761_v4 = vpop.eup %760  ;;  %774 = vpow2.f32 %v180_v24 }
 0x1a2   :  { %v763_v46 = vpop.eup %762  ;;  %728 = vmatprep.mubr.msk.f32.mxu1 %vm139_vm0, %v761_v4  ;;  %v288_v13 = vsel %vm139_vm0, %v761_v4, 0.0  ;;  %776 = vpow2.f32 %v184_v31 }
 0x1a3   :  { %723 = vmatmul.mubr.msk.f32.vlgmr.msra.gmra.mxu0 %vm139_vm0, %v763_v46  ;;  %v279_v45 = vsel %vm139_vm0, %v763_v46, 0.0  ;;  %778 = vpow2.f32 %v186_v54 }
 0x1a4   :  { %280 = vadd.xlane.f32.xlu1 %v279_v45  ;;  %780 = vpow2.f32 %v182_v57 }
 0x1a5   :  { %v765_v5 = vpop.eup %764  ;;  %782 = vpow2.f32 %v190_v32 }
 0x1a6   :  { %v767_v49 = vpop.eup %766  ;;  %725 = vmatprep.mubr.msk.f32.mxu0 %vm139_vm0, %v765_v5  ;;  %v282_v8 = vsel %vm139_vm0, %v765_v5, 0.0  ;;  %784 = vpow2.f32 %v188_v63 }
 0x1a7   :  { %729 = vmatmul.mubr.msk.f32.vlgmr.msra.gmra.mxu1 %vm139_vm0, %v767_v49  ;;  %283 = vadd.xlane.f32.xlu0 %v282_v8  ;;  %v291_v29 = vsel %vm139_vm0, %v767_v49, 0.0  ;;  %786 = vpow2.f32 %v194_v6 }
 0x1a8   :  { %289 = vadd.xlane.f32.xlu1 %v288_v13  ;;  %788 = vpow2.f32 %v192_v56 }
 0x1a9   :  { %v769_v14 = vpop.eup %768 }
 0x1aa   :  { %v771_v15 = vpop.eup %770  ;;  %726 = vmatmul.mubr.msk.f32.gmra.mxu0 %vm139_vm0, %v769_v14  ;;  %v285_v19 = vsel %vm139_vm0, %v769_v14, 0.0 }
 0x1ab   :  { %731 = vmatprep.mubr.msk.f32.mxu1 %vm139_vm0, %v771_v15  ;;  %286 = vadd.xlane.f32.xlu0 %v285_v19  ;;  %v294_v25 = vsel %vm139_vm0, %v771_v15, 0.0 }
 0x1ac   :  { %295 = vadd.xlane.f32.xlu1 %v294_v25 }
 0x1ad   :  { %v773_v27 = vpop.eup %772 }
 0x1ae   :  { %732 = vmatmul.mubr.msk.f32.gmra.mxu1 %vm139_vm0, %v773_v27  ;;  %v297_v52 = vsel %vm139_vm0, %v773_v27, 0.0  ;;  %v775_v9 = vpop.eup %774 }
 0x1af   :  { %292 = vadd.xlane.f32.xlu0 %v291_v29  ;;  %v777_v61 = vpop.eup %776  ;;  %v268_v12 = vmul.f32 %v775_v9, %v260_v11 }
 0x1b0   :  { %v779_v0 = vpop.eup %778  ;;  %v270_v33 = vmul.f32 %v777_v61, %v262_v22 }
 0x1b1   :  { %v781_v55 = vpop.eup %780  ;;  %v271_v44 = vmul.f32 %v779_v0, %v263_v37 }
 0x1b2   :  { %v783_v60 = vpop.eup %782  ;;  %v269_v18 = vmul.f32 %v781_v55, %v261_v17 }
 0x1b3   :  { %298 = vadd.xlane.f32.xlu0 %v297_v52  ;;  %v785_v1 = vpop.eup %784  ;;  %v273_v30 = vmul.f32 %v783_v60, %v265_v20 }
 0x1b4   :  { %v787_v2 = vpop.eup %786  ;;  %v272_v36 = vmul.f32 %v785_v1, %v264_v26 }
 0x1b5   :  { %v789_v7 = vpop.eup %788  ;;  %v275_v35 = vmul.f32 %v787_v2, %v267_v59 }
 0x1b6   :  { %v274_v48 = vmul.f32 %v789_v7, %v266_v41 }
 0x1bd   :  { %327 = vperm.xlu1 %757, %v775_v9  }
 0x1c1   :  { %337 = vperm.xlu1 %757, %v777_v61  }
 0x1c5   :  { %342 = vperm.xlu1 %757, %v779_v0  }
 0x1c9   :  { %352 = vperm.xlu1 %757, %v783_v60   ;;  %332 = vperm.xlu0 %756, %v781_v55  }
 0x1cd   :  { %362 = vperm.xlu1 %757, %v787_v2   ;;  %347 = vperm.xlu0 %756, %v785_v1  }
 0x1d1   :  { %357 = vperm.xlu0 %756, %v789_v7  }
 0x228   :  { %v278_v10 = vpop.xlane.xlu0 %277 }
 0x229   :  { %v300_v16 = vadd.f32 %v278_v10, %v268_v12 }
 0x22b   :  { %309 = vst.msk [vmem:[#allocation3] sm:$0xff] %vm19_vm5, %v300_v16 }
 0x22d   :  { %v281_v23 = vpop.xlane.xlu1 %280 }
 0x22e   :  { %v301_v28 = vadd.f32 %v281_v23, %v269_v18 }
 0x230   :  { %310 = vst.msk [vmem:[#allocation3 + $0x8] sm:$0xff] %vm19_vm5, %v301_v28  ;;  %v284_v34 = vpop.xlane.xlu0 %283 }
 0x231   :  { %v302_v38 = vadd.f32 %v284_v34, %v270_v33  ;;  %v290_v39 = vpop.xlane.xlu1 %289 }
 0x232   :  { %v304_v42 = vadd.f32 %v290_v39, %v272_v36  ;;  %v537_v43 = vld [vmem:[#allocation3] sm:$0xff] }
 0x233   :  { %311 = vst.msk [vmem:[#allocation3 + $0x10] sm:$0xff] %vm19_vm5, %v302_v38  ;;  %790 = vrcp.f32 %v537_v43 }
 0x234   :  { %313 = vst.msk [vmem:[#allocation3 + $0x20] sm:$0xff] %vm19_vm5, %v304_v42  ;;  %v287_v47 = vpop.xlane.xlu0 %286 }
 0x235   :  { %v303_v50 = vadd.f32 %v287_v47, %v271_v44  ;;  %v296_v51 = vpop.xlane.xlu1 %295 }
 0x236   :  { %v306_v53 = vadd.f32 %v296_v51, %v274_v48 }
 0x237   :  { %312 = vst.msk [vmem:[#allocation3 + $0x18] sm:$0xff] %vm19_vm5, %v303_v50  ;;  %v538_v21 = vld [vmem:[#allocation3 + $0x8] sm:$0xff] }
 0x238   :  { %315 = vst.msk [vmem:[#allocation3 + $0x30] sm:$0xff] %vm19_vm5, %v306_v53  ;;  %v293_v58 = vpop.xlane.xlu0 %292  ;;  %792 = vrcp.f32 %v538_v21 }
 0x239   :  { %v305_v62 = vadd.f32 %v293_v58, %v273_v30  ;;  %v328_v31 = vpop.permute.xlu1 %327 }
 0x23a   :  { %v539_v40 = vld [vmem:[#allocation3 + $0x10] sm:$0xff]  ;;  %v365_v61 = vmul.f32 0.0, %v328_v31 }
 0x23b   :  { %314 = vst.msk [vmem:[#allocation3 + $0x28] sm:$0xff] %vm19_vm5, %v305_v62  ;;  %794 = vrcp.f32 %v539_v40  ;;  %v541_v3 = vld [vmem:[#allocation3 + $0x20] sm:$0xff] }
 0x23c   :  { %v299_v4 = vpop.xlane.xlu0 %298  ;;  %796 = vrcp.f32 %v541_v3 }
 0x23d   :  { %v307_v46 = vadd.f32 %v299_v4, %v275_v35  ;;  %v338_v52 = vpop.permute.xlu1 %337 }
 0x23e   :  { %v540_v45 = vld [vmem:[#allocation3 + $0x18] sm:$0xff]  ;;  %v367_v17 = vmul.f32 0.0, %v338_v52 }
 0x23f   :  { %316 = vst.msk [vmem:[#allocation3 + $0x38] sm:$0xff] %vm19_vm5, %v307_v46  ;;  %798 = vrcp.f32 %v540_v45  ;;  %v543_v5 = vld [vmem:[#allocation3 + $0x30] sm:$0xff] }
 0x240   :  { %v791_v49 = vpop.eup %790  ;;  %800 = vrcp.f32 %v543_v5 }
 0x241   :  { %563 = vperm.xlu0 %756, %v791_v49   ;;  %v343_v57 = vpop.permute.xlu1 %342 }
 0x242   :  { %v542_v8 = vld [vmem:[#allocation3 + $0x28] sm:$0xff]  ;;  %v368_v36 = vmul.f32 0.0, %v343_v57 }
 0x243   :  { %802 = vrcp.f32 %v542_v8 }
 0x244   :  { %v333_v54 = vpop.permute.xlu0 %332 }
 0x245   :  { %v793_v13 = vpop.eup %792  ;;  %v353_v6 = vpop.permute.xlu1 %352  ;;  %v366_v11 = vmul.f32 0.0, %v333_v54 }
 0x246   :  { %568 = vperm.xlu1 %757, %v793_v13   ;;  %v544_v14 = vld [vmem:[#allocation3 + $0x38] sm:$0xff]  ;;  %v370_v44 = vmul.f32 0.0, %v353_v6 }
 0x247   :  { %804 = vrcp.f32 %v544_v14 }
 0x248   :  { %v795_v15 = vpop.eup %794  ;;  %v348_v32 = vpop.permute.xlu0 %347 }
 0x249   :  { %573 = vperm.xlu0 %756, %v795_v15   ;;  %v797_v19 = vpop.eup %796  ;;  %v363_v1 = vpop.permute.xlu1 %362  ;;  %v369_v37 = vmul.f32 0.0, %v348_v32 }
 0x24a   :  { %v372_v40 = vmul.f32 0.0, %v363_v1 }
 0x24c   :  { %v799_v24 = vpop.eup %798  ;;  %v358_v9 = vpop.permute.xlu0 %357 }
 0x24d   :  { %578 = vperm.xlu1 %757, %v799_v24   ;;  %583 = vperm.xlu0 %756, %v797_v19   ;;  %v801_v25 = vpop.eup %800  ;;  %v371_v20 = vmul.f32 0.0, %v358_v9 }
 0x250   :  { %v803_v27 = vpop.eup %802 }
 0x251   :  { %588 = vperm.xlu1 %757, %v803_v27   ;;  %593 = vperm.xlu0 %756, %v801_v25  }
 0x254   :  { %v805_v29 = vpop.eup %804 }
 0x255   :  { %598 = vperm.xlu1 %757, %v805_v29  }
 0x263   :  { %v724_v63 = vpop.f32.mrf.mxu0 }
 0x264   :  { %v511_v10 = vadd.f32 %v724_v63, %v366_v11 }
 0x265   :  { %v471_v56 = vpop.f32.mrf.mxu0 }
 0x266   :  { %v510_v0 = vadd.f32 %v471_v56, %v365_v61 }
 0x267   :  { %v730_v2 = vpop.f32.mrf.mxu1 }
 0x268   :  { %v515_v53 = vadd.f32 %v730_v2, %v370_v44 }
 0x269   :  { %v491_v18 = vpop.f32.mrf.mxu1 }
 0x26a   :  { %v727_v55 = vpop.f32.mrf.mxu0  ;;  %v514_v39 = vadd.f32 %v491_v18, %v369_v37 }
 0x26b   :  { %v513_v41 = vadd.f32 %v727_v55, %v368_v36 }
 0x26c   :  { %v481_v16 = vpop.f32.mrf.mxu0 }
 0x26d   :  { %v512_v26 = vadd.f32 %v481_v16, %v367_v17 }
 0x26e   :  { %v733_v28 = vpop.f32.mrf.mxu1 }
 0x26f   :  { %v517_v46 = vadd.f32 %v733_v28, %v372_v40 }
 0x270   :  { %v501_v42 = vpop.f32.mrf.mxu1 }
 0x271   :  { %v516_v30 = vadd.f32 %v501_v42, %v371_v20 }
 0x2bc   :  { %v564_v60 = vpop.permute.xlu0 %563 }
 0x2bd   :  { %v601_v7 = vmul.f32 %v564_v60, %v510_v0 }
 0x2bf   :  { %v617_v12 = vmul.f32 1.442695, %v601_v7  ;;  %vm609_vm10 = vcmp.gt.f32.partialorder %v601_v7, 0.0 }
 0x2c1   :  { %806 = vpow2.f32 %v617_v12  ;;  %v569_v22 = vpop.permute.xlu1 %568 }
 0x2c2   :  { %v602_v23 = vmul.f32 %v569_v22, %v511_v10 }
 0x2c4   :  { %v619_v33 = vmul.f32 1.442695, %v602_v23  ;;  %v574_v34 = vpop.permute.xlu0 %573  ;;  %vm610_vm11 = vcmp.gt.f32.partialorder %v602_v23, 0.0 }
 0x2c5   :  { %v603_v38 = vmul.f32 %v574_v34, %v512_v26 }
 0x2c6   :  { %808 = vpow2.f32 %v619_v33 }
 0x2c7   :  { %v621_v43 = vmul.f32 1.442695, %v603_v38  ;;  %vm611_vm12 = vcmp.gt.f32.partialorder %v603_v38, 0.0 }
 0x2c8   :  { %v579_v47 = vpop.permute.xlu1 %578  ;;  %v584_v48 = vpop.permute.xlu0 %583 }
 0x2c9   :  { %810 = vpow2.f32 %v621_v43  ;;  %v604_v50 = vmul.f32 %v579_v47, %v513_v41  ;;  %v605_v51 = vmul.f32 %v584_v48, %v514_v39 }
 0x2cb   :  { %v623_v21 = vmul.f32 1.442695, %v604_v50  ;;  %v625_v58 = vmul.f32 1.442695, %v605_v51  ;;  %vm612_vm13 = vcmp.gt.f32.partialorder %v604_v50, 0.0  ;;  %vm613_vm14 = vcmp.gt.f32.partialorder %v605_v51, 0.0 }
 0x2cc   :  { %v589_v59 = vpop.permute.xlu1 %588  ;;  %v594_v62 = vpop.permute.xlu0 %593 }
 0x2cd   :  { %812 = vpow2.f32 %v623_v21  ;;  %v606_v35 = vmul.f32 %v589_v59, %v515_v53  ;;  %v607_v3 = vmul.f32 %v594_v62, %v516_v30 }
 0x2ce   :  { %v807_v4 = vpop.eup %806  ;;  %814 = vpow2.f32 %v625_v58 }
 0x2cf   :  { %v682_v45 = vadd.f32 -1.0, %v807_v4  ;;  %v627_v5 = vmul.f32 1.442695, %v606_v35  ;;  %v629_v49 = vmul.f32 1.442695, %v607_v3  ;;  %vm614_vm15 = vcmp.gt.f32.partialorder %v606_v35, 0.0 }
 0x2d0   :  { %v599_v8 = vpop.permute.xlu1 %598  ;;  %vm615_vm0 = vcmp.gt.f32.partialorder %v607_v3, 0.0 }
 0x2d1   :  { %v641_v13 = vsel %vm609_vm10, %v601_v7, %v682_v45  ;;  %816 = vpow2.f32 %v627_v5  ;;  %v608_v14 = vmul.f32 %v599_v8, %v517_v46 }
 0x2d2   :  { %649 = vst [vmem:[#allocation5] sm:$0xff] %v641_v13  ;;  %818 = vpow2.f32 %v629_v49 }
 0x2d3   :  { %v809_v15 = vpop.eup %808  ;;  %v631_v19 = vmul.f32 1.442695, %v608_v14  ;;  %vm616_vm1 = vcmp.gt.f32.partialorder %v608_v14, 0.0 }
 0x2d4   :  { %v683_v24 = vadd.f32 -1.0, %v809_v15 }
 0x2d5   :  { %820 = vpow2.f32 %v631_v19 }
 0x2d6   :  { %v811_v25 = vpop.eup %810  ;;  %v642_v27 = vsel %vm610_vm11, %v602_v23, %v683_v24 }
 0x2d7   :  { %650 = vst [vmem:[#allocation5 + $0x8] sm:$0xff] %v642_v27  ;;  %v684_v29 = vadd.f32 -1.0, %v811_v25 }
 0x2d9   :  { %v643_v31 = vsel %vm611_vm12, %v603_v38, %v684_v29 }
 0x2da   :  { %v813_v52 = vpop.eup %812  ;;  %651 = vst [vmem:[#allocation5 + $0x10] sm:$0xff] %v643_v31 }
 0x2db   :  { %v815_v54 = vpop.eup %814  ;;  %v685_v57 = vadd.f32 -1.0, %v813_v52 }
 0x2dc   :  { %v686_v32 = vadd.f32 -1.0, %v815_v54 }
 0x2dd   :  { %v644_v63 = vsel %vm612_vm13, %v604_v50, %v685_v57 }
 0x2de   :  { %v817_v6 = vpop.eup %816  ;;  %652 = vst [vmem:[#allocation5 + $0x18] sm:$0xff] %v644_v63  ;;  %v645_v9 = vsel %vm613_vm14, %v605_v51, %v686_v32 }
 0x2df   :  { %v819_v56 = vpop.eup %818  ;;  %653 = vst [vmem:[#allocation5 + $0x20] sm:$0xff] %v645_v9  ;;  %v687_v61 = vadd.f32 -1.0, %v817_v6 }
 0x2e0   :  { %v688_v0 = vadd.f32 -1.0, %v819_v56 }
 0x2e1   :  { %v646_v55 = vsel %vm614_vm15, %v606_v35, %v687_v61 }
 0x2e2   :  { %v821_v60 = vpop.eup %820  ;;  %654 = vst [vmem:[#allocation5 + $0x28] sm:$0xff] %v646_v55  ;;  %v647_v1 = vsel %vm615_vm0, %v607_v3, %v688_v0 }
 0x2e3   :  { %655 = vst [vmem:[#allocation5 + $0x30] sm:$0xff] %v647_v1  ;;  %v689_v2 = vadd.f32 -1.0, %v821_v60 }
 0x2e5   :  { %v648_v7 = vsel %vm616_vm1, %v608_v14, %v689_v2 }
 0x2e6   :  { %656 = vst [vmem:[#allocation5 + $0x38] sm:$0xff] %v648_v7 }
 0x2e7   :  { %833 = shalt.err (!%p830_p4)
}
 0x2e8   :  { %s848_s19 = smov 128   ;;  %s849_s20 = smov 8  }
 0x2e9   :  { %668 = dma.vmem_to_hbm [thread:$0]  %s663_s17, 1024, %s1112_s3, [#allocation6], %s848_s19, %s848_s19, %s849_s20  }
 0x2ea   :  { %842 = dma.done.wait [#allocation6], 1024  }
 0x2eb   :  { %843 = vsyncadd [#allocation6], 4294966272 }
 0x2ec   :  { %672 = vsyncpa [#allocation6], 1 }

</bundles_post_ra>
